<compile_context>
chip_gen: v6e
topology: v6e:2x2x1
jax: 0.10.0
libtpu: 0.0.40
codegen_flags: <defaults>
</compile_context>

<pallas_src>
import functools

import jax
import jax.numpy as jnp
from jax.experimental import pallas as pl
from jax.experimental.pallas import tpu as pltpu


def _dw_tconv_kernel(x_ref, w_ref, b_ref, o_ref, *, k_max, t_out):
    """Depthwise temporal conv on one (row_block, T) slab.

    x_ref: (rb, T)      input rows (row = one (n, c) pair), full temporal axis
    w_ref: (rb, k_max)  per-row taps, centered; residual already folded in
    b_ref: (rb, 1)      per-row bias
    o_ref: (rb, T)      output rows
    """
    halo = k_max // 2
    xf = x_ref[...].astype(jnp.float32)               # cast once, reuse below
    rb = xf.shape[0]
    # Center tap (carries the folded residual) + bias seeds the accumulator.
    acc = (b_ref[...].astype(jnp.float32)
           + w_ref[:, halo:halo + 1].astype(jnp.float32) * xf)
    for j in range(k_max):                            # static unroll over taps
        if j == halo:
            continue
        d = j - halo
        tap = w_ref[:, j:j + 1].astype(jnp.float32)   # (rb, 1)
        # Shifted view with explicit zero edges ('same' padding handled here,
        # no wrapper-side jnp.pad / extra HBM pass).  Static slices + concat;
        # on v5e a pltpu.roll(+mask) variant would route this via the XLU.
        if d < 0:
            s = -d
            xs = jnp.concatenate(
                [jnp.zeros((rb, s), jnp.float32), xf[:, :t_out - s]], axis=-1)
        else:
            xs = jnp.concatenate(
                [xf[:, d:], jnp.zeros((rb, d), jnp.float32)], axis=-1)
        acc = acc + tap * xs
    o_ref[...] = acc.astype(o_ref.dtype)


def _target_block_bytes():
    # ~4 MiB blocks on v5e/v6e (128 MiB physical VMEM), ~2 MiB on v7x
    # (64 MiB physical VMEM, 2 TensorCores -> favor more, smaller grid steps).
    try:
        kind = jax.devices()[0].device_kind.lower()
    except Exception:
        kind = ""
    if "v5" in kind or "v6" in kind:
        return 4 * 1024 * 1024
    return 2 * 1024 * 1024


def _pick_row_block(n_rows, t, itemsize, target_bytes):
    """Row tile: packed-sublane multiple, sized toward target_bytes, >=2 blocks."""
    sub = max(8, 32 // itemsize)          # 8 (f32) / 16 (bf16) / 32 (int8/fp8)
    if n_rows % sub != 0:
        return n_rows                     # block must then cover full row dim
    rb = n_rows
    while rb % (2 * sub) == 0 and rb * t * itemsize > target_bytes:
        rb //= 2
    # Megacore: make sure the grid has >=2 blocks so both TensorCores get work.
    if n_rows // rb < 2 and rb % (2 * sub) == 0:
        rb //= 2
    return rb


def depthwise_tconv(x, taps, bias):
    """y[n,c,t] = sum_j taps[c,j] * x[n,c,t + j - k_max//2] + bias[c].

    The residual (if any) must already be folded into taps[:, k_max//2]."""
    N, C, T = x.shape
    C_t, k_max = taps.shape
    assert C_t == C and bias.shape == (C,)

    R = N * C
    x2 = x.reshape(R, T)                                        # free reshape
    taps_r = jnp.tile(taps.astype(jnp.float32), (N, 1))         # (R, k_max)
    bias_r = jnp.tile(bias.astype(jnp.float32).reshape(C, 1), (N, 1))  # (R, 1)

    rb = _pick_row_block(R, T, x.dtype.itemsize, _target_block_bytes())
    grid = (R // rb,)

    # Scoped-VMEM budget: double-buffered in+out blocks plus f32 temporaries.
    block_bytes = rb * T * x.dtype.itemsize
    need = 4 * block_bytes + (k_max + 3) * rb * T * 4 + (1 << 20)
    vmem_limit = int(min(max(need, 16 << 20), 32 << 20))

    kernel = functools.partial(_dw_tconv_kernel, k_max=k_max, t_out=T)

    out2 = pl.pallas_call(
        kernel,
        out_shape=jax.ShapeDtypeStruct((R, T), x.dtype),
        grid=grid,
        in_specs=[
            pl.BlockSpec((rb, T), lambda i: (i, 0)),
            pl.BlockSpec((rb, k_max), lambda i: (i, 0)),
            pl.BlockSpec((rb, 1), lambda i: (i, 0)),
        ],
        out_specs=pl.BlockSpec((rb, T), lambda i: (i, 0)),
        compiler_params=pltpu.CompilerParams(
            dimension_semantics=("parallel",),
            vmem_limit_bytes=vmem_limit),
    )(x2, taps_r, bias_r)
    return out2.reshape(N, C, T)


def mixtconv_forward(x, conv1_weight, conv1_bias, *, split=4):
    """Faithful port of MixTConv.forward: conv1 (depthwise k=1) is applied to
    every chunk — exactly as the reference code does — then the residual add.
    Residual is folded into the (single, centered) tap: scale = 1 + w."""
    N, C, T = x.shape
    assert C % split == 0
    c4 = C // split
    w1 = conv1_weight.reshape(c4).astype(jnp.float32)  # PyTorch (C//4,1,1) weight
    b1 = conv1_bias.reshape(c4).astype(jnp.float32)
    taps = (jnp.tile(w1, split) + 1.0).reshape(C, 1)   # +1.0: folded residual
    bias = jnp.tile(b1, split)
    return depthwise_tconv(x, taps, bias)


def mixtconv_mixed_forward(x, weights, biases, *, split=4):
    """'Intended' MixTConv: chunk i -> depthwise Conv1d with kernel (1,3,5,7)[i],
    padding k//2 (what conv1..conv4 would do if forward() used them), + residual.
    The reference forward() as written only ever calls conv1 (mixtconv_forward);
    this path is provided/verified to show the kernel handles the mixed case."""
    N, C, T = x.shape
    assert C % split == 0
    c4 = C // split
    k_max = max(int(w.shape[-1]) for w in weights)
    halo = k_max // 2
    taps = jnp.zeros((C, k_max), jnp.float32)
    bias = jnp.zeros((C,), jnp.float32)
    for i, (w, b) in enumerate(zip(weights, biases)):
        k = int(w.shape[-1])
        off = halo - k // 2                            # center the k taps
        taps = taps.at[i * c4:(i + 1) * c4, off:off + k].set(
            w.reshape(c4, k).astype(jnp.float32))
        bias = bias.at[i * c4:(i + 1) * c4].set(b.reshape(c4).astype(jnp.float32))
    taps = taps.at[:, halo].add(1.0)                   # fold residual
    return depthwise_tconv(x, taps, bias)


# --------------------------- pure-JAX references ---------------------------

def _ref_forward(x, w1, b1, split=4):
    N, C, T = x.shape
    c4 = C // split
    scale = jnp.tile(w1.reshape(c4), split)[None, :, None]
    shift = jnp.tile(b1.reshape(c4), split)[None, :, None]
    return x * scale + shift + x


def _ref_mixed(x, weights, biases, split=4):
    N, C, T = x.shape
    c4 = C // split
    outs = []
    for i, (w, b) in enumerate(zip(weights, biases)):
        k = int(w.shape[-1])
        pad = k // 2
        xi = x[:, i * c4:(i + 1) * c4, :]
        xpad = jnp.pad(xi, ((0, 0), (0, 0), (pad, pad)))
        yi = jnp.zeros_like(xi) + b.reshape(1, c4, 1)
        for j in range(k):
            yi = yi + w.reshape(c4, k)[:, j][None, :, None] * xpad[:, :, j:j + T]
        outs.append(yi)
    return jnp.concatenate(outs, axis=1) + x


if __name__ == "__main__":
    key = jax.random.PRNGKey(0)
    N, C, T = 2, 8, 16            # (batch, channels, temporal); split=4 -> 2 ch/chunk
    split = 4
    c4 = C // split

    k_x, k_w1, k_b1, *k_rest = jax.random.split(key, 12)
    x = jax.random.normal(k_x, (N, C, T), dtype=jnp.float32)

    # conv1: depthwise kernel_size=1 Conv1d -> weight (C//4, 1, 1), bias (C//4,)
    w1 = jax.random.normal(k_w1, (c4, 1, 1), dtype=jnp.float32) * 0.5
    b1 = jax.random.normal(k_b1, (c4,), dtype=jnp.float32) * 0.1

    # --- Faithful MixTConv.forward (conv1 on every chunk + residual) ---------
    y = mixtconv_forward(x, w1, b1, split=split)
    y = jax.block_until_ready(y)
    y_ref = _ref_forward(x, w1, b1, split=split)
    assert y.shape == x.shape
    assert y.dtype == x.dtype
    assert jnp.allclose(y, y_ref, rtol=1e-5, atol=1e-5)

    # --- Mixed 1/3/5/7 variant: exercises the temporal taps + in-kernel halo --
    ks = (1, 3, 5, 7)
    weights, biases = [], []
    for i, k in enumerate(ks):
        kw, kb = k_rest[2 * i], k_rest[2 * i + 1]
        weights.append(jax.random.normal(kw, (c4, 1, k), dtype=jnp.float32) * 0.3)
        biases.append(jax.random.normal(kb, (c4,), dtype=jnp.float32) * 0.1)
    y_mix = mixtconv_mixed_forward(x, weights, biases, split=split)
    y_mix = jax.block_until_ready(y_mix)
    y_mix_ref = _ref_mixed(x, weights, biases, split=split)
    assert jnp.allclose(y_mix, y_mix_ref, rtol=1e-5, atol=1e-5)

    print("KERNEL_OK")
</pallas_src>

<mosaic_0001>
module attributes {stable_mosaic.version = 11 : i64} {
  func.func @_dw_tconv_kernel(%arg0: i32, %arg1: memref<8x16xf32, #tpu.memory_space<vmem>>, %arg2: memref<8x1xf32, #tpu.memory_space<vmem>>, %arg3: memref<8x1xf32, #tpu.memory_space<vmem>>, %arg4: memref<8x16xf32, #tpu.memory_space<vmem>>) attributes {dimension_semantics = [#tpu.dimension_semantics<parallel>], iteration_bounds = array<i64: 2>, scalar_prefetch = 0 : i64, scratch_operands = 0 : i64, tpu.core_type = #tpu.core_type<tc>, window_params = [{transform_indices = @transform_0, window_bounds = array<i64: 8, 16>}, {transform_indices = @transform_1, window_bounds = array<i64: 8, 1>}, {transform_indices = @transform_2, window_bounds = array<i64: 8, 1>}, {transform_indices = @transform_3, window_bounds = array<i64: 8, 16>}]} {
    %c0 = arith.constant 0 : index
    %c0_0 = arith.constant 0 : index
    %0 = vector.load %arg1[%c0, %c0_0] : memref<8x16xf32, #tpu.memory_space<vmem>>, vector<8x16xf32>
    %c0_1 = arith.constant 0 : index
    %c0_2 = arith.constant 0 : index
    %1 = vector.load %arg3[%c0_1, %c0_2] : memref<8x1xf32, #tpu.memory_space<vmem>>, vector<8x1xf32>
    %c0_3 = arith.constant 0 : index
    %c0_4 = arith.constant 0 : index
    %2 = vector.load %arg2[%c0_3, %c0_4] : memref<8x1xf32, #tpu.memory_space<vmem>>, vector<8x1xf32>
    %3 = vector.broadcast %2 : vector<8x1xf32> to vector<8x16xf32>
    %4 = arith.mulf %3, %0 : vector<8x16xf32>
    %5 = vector.broadcast %1 : vector<8x1xf32> to vector<8x16xf32>
    %6 = arith.addf %5, %4 : vector<8x16xf32>
    %c0_5 = arith.constant 0 : index
    %c0_6 = arith.constant 0 : index
    %7 = vector.load %arg4[%c0_5, %c0_6] : memref<8x16xf32, #tpu.memory_space<vmem>>, vector<8x16xf32>
    tpu.vector_store %arg4[%c0_5, %c0_6], %6 {strides = array<i32>} : memref<8x16xf32, #tpu.memory_space<vmem>>, vector<8x16xf32>,
    return
  }
  func.func @transform_0(%arg0: i32) -> (i32, i32) {
    %c0_i32 = arith.constant 0 : i32
    %c0_i32_0 = arith.constant 0 : i32
    return %arg0, %c0_i32 : i32, i32
  }
  func.func @transform_1(%arg0: i32) -> (i32, i32) {
    %c0_i32 = arith.constant 0 : i32
    %c0_i32_0 = arith.constant 0 : i32
    return %arg0, %c0_i32 : i32, i32
  }
  func.func @transform_2(%arg0: i32) -> (i32, i32) {
    %c0_i32 = arith.constant 0 : i32
    %c0_i32_0 = arith.constant 0 : i32
    return %arg0, %c0_i32 : i32, i32
  }
  func.func @transform_3(%arg0: i32) -> (i32, i32) {
    %c0_i32 = arith.constant 0 : i32
    %c0_i32_0 = arith.constant 0 : i32
    return %arg0, %c0_i32 : i32, i32
  }
}

</mosaic_0001>

<bundles_post_ra>
// kernel: tpu_custom_call.1
= control target key start
LH: loop header
LB: loop body
LE: loop exit
PB: predicated region body
PF: predicated region fallthrough
CT: control target
= control target key end

     0   :  { %8 = vsyncpa [#allocation3], 0  ;;  %s544_s0 = inlined_call_operand.vmem [shape: f32[16,16], index: 0, kind: input, shape index: {}]   ;;  %s545_s1 = inlined_call_operand.vmem [shape: f32[16,1], index: 1, kind: input, shape index: {}]   ;;  %s546_s2 = inlined_call_operand.vmem [shape: f32[16,1], index: 2, kind: input, shape index: {}]   ;;  %s547_s3 = inlined_call_operand.hbm [shape: f32[16,16], index: 3, kind: output, shape index: {}]  }
   0x1   :  { %10 = vsyncpa [#allocation3 + $0x1], 0  ;;  %s451_s12 = smov 0   ;;  %s453_s13 = smov 0  }
   0x2   :  { %s455_s14 = smov 0   ;;  %s457_s15 = smov 0  }
   0x3 LB: > { %s472_s16 = sadd.s32 4294967295, %s427_s15   ;;  %s314_s17 = sadd.s32 4294967294, %s427_s15   ;;  %s427_s15 = sphi %s457_s15, %s553_s15   ;;  %s423_s14 = sphi %s455_s14, %s552_s14   ;;  %s419_s13 = sphi %s453_s13, %s551_s13   ;;  %s415_s12 = sphi %s451_s12, %s550_s12  }
   0x4   : > { %s476_s18 = sadd.s32 1, %s427_s15   ;;  %s101_s19 = sadd.s32 1, %s423_s14 }
   0x5   : > { %s98_s20 = ssub.s32 %s427_s15, %s476_s18  ;;  %p111_p0 = scmp.ne.s32.totalorder %s423_s14, %s419_s13 }
   0x6   : > { %p99_p1 = scmp.eq.s32.totalorder %s98_s20, 0  ;;  %p112_p2 = scmp.eq.s32.totalorder %s472_s16, 1 }
   0x7   : > { %p117_p3 = scmp.ne.s32.totalorder %s419_s13, %s415_s12  ;;  %p118_p4 = scmp.eq.s32.totalorder %s314_s17, 1 }
   0x8   : > { %s487_s21 = scalar_select %p99_p1, %s423_s14, %s101_s19  }
   0x9   : > { %p489_p5 = por %p112_p2, %p111_p0  ;;  %p493_p6 = por %p118_p4, %p117_p3 }
   0xa   : > { %p317_p7 = scmp.ge.s32.totalorder %s427_s15, 1  ;;  %p157_p8 = scmp.lt.s32.totalorder %s427_s15, 3 }
   0xc   : > { %p158_p9 = pnand %p317_p7, %p157_p8 }
   0xd   : > { %p188_p10 = scmp.lt.s32.totalorder (!%p158_p9), %s472_s16, 1  ;;  %s185_s5 = sand.u32 (!%p158_p9), 1, %s419_s13  }
   0xe   : > { %161 = sbr.rel (%p158_p9) target bundleno = 167 (0xa7), region = 32  ;;  %s318_s6 = sshll.u32 (!%p158_p9), %s185_s5, 3 }
   0xf   : > { %s323_s10 = sshll.u32 (!%p158_p9), %s472_s16, 7  ;;  %s187_s11 = scalar_lea.vmem (!%p158_p9), [#allocation2], %s318_s6 }
  0x10   : > { %s231_s17 = sshll.u32 (!%p158_p9), %s187_s11, 4  ;;  %s218_s26 = scalar_lea.sflag (!%p158_p9), [#allocation3], %s185_s5  ;;  %s232_s17 = int_to_ptr.vmem [resolvable:$true] %s231_s17 }
  0x11   : > { %s367_s27 = scalar_lea.vmem (!%p158_p9), %s232_s17, 128 }
  0x12   : > { %p368_p11 = scmp.ne.s32.totalorder (!%p158_p9), %s232_s17, %s367_s27 }
  0x13   : > { %v429_v0 = vmov 0   ;;  %s189_s24 = scalar_select %p188_p10, %s472_s16, 1  ;;  %vm215_vm0 = vcmask 130048  }
  0x14   : > { %366 = vset.pattern.permute.xlu0 %v429_v0  ;;  %p369_p12 = pnand %p368_p11, %p489_p5 }
  0x15   : > { %s319_s25 = sshll.u32 %s189_s24, 3  ;;  %s229_s24 = scalar_lea.hbm %s547_s3, %s323_s10 }
  0x16   : > { %s195_s28 = scalar_lea.vmem %s545_s1, %s319_s25  ;;  %s199_s4 = scalar_lea.vmem %s546_s2, %s319_s25 }
  0x17   : > { %v202_v1 = vld [vmem:[%s195_s28] sm:$0xff]  ;;  %s191_s9 = scalar_lea.vmem %s544_s0, %s319_s25  ;;  %p370_p13 = pneg %p369_p12 }
  0x18   : > { %205 = vperm.xlu0 %366, %v202_v1   ;;  %v201_v2 = vld [vmem:[%s199_s4] sm:$0xff]  ;;  %s430_s25 = smov [#allocation2]  }
  0x19   : > { %v200_v4 = vld [vmem:[%s191_s9] sm:$0xff]  ;;  %s371_s16 = sshll.u32 %s430_s25, 4  ;;  %s372_s16 = int_to_ptr.vmem [resolvable:$false] %s371_s16 }
  0x1a   : > { %s373_s28 = scalar_lea.vmem %s372_s16, 256  ;;  %p374_p0 = scmp.lt.s32.totalorder %s232_s17, %s372_s16 }
  0x1b   : > { %p375_p1 = scmp.lt.s32.totalorder %s373_s28, %s367_s27 }
  0x1c   : > { %211 = vperm.xlu0 %366, %v201_v2  }
  0x1d   : > { %p376_p2 = por %p375_p1, %p374_p0 }
  0x1f   : > { %p377_p3 = pnand %p376_p2, %p370_p13 }
  0x93   : > { %v206_v3 = vpop.permute.xlu0 %205 }
  0x94   : > { %v208_v5 = vmul.f32 %v206_v3, %v200_v4 }
  0x97   : > { %v212_v6 = vpop.permute.xlu0 %211 }
  0x98   : > { %v214_v7 = vadd.f32 %v212_v6, %v208_v5 }
  0x9a   : > { %216 = vst.msk [vmem:[%s187_s11] sm:$0xff] %vm215_vm0, %v214_v7 }
  0x9b   : > { %380 = shalt.err (!%p377_p3)
}
  0x9c   : > { %s381_s29 = scalar_lea.hbm %s229_s24, 128  ;;  %s385_s5 = scalar_lea.hbm %s547_s3, 256 }
  0x9d   : > { %p382_p4 = scmp.ne.s32.totalorder %s229_s24, %s381_s29  ;;  %p386_p9 = scmp.lt.s32.totalorder %s229_s24, %s547_s3 }
  0x9e   : > { %p387_p10 = scmp.lt.s32.totalorder %s385_s5, %s381_s29 }
  0x9f   : > { %p383_p7 = pnand %p382_p4, %p489_p5 }
  0xa0   : > { %p388_p11 = por %p387_p10, %p386_p9 }
  0xa1   : > { %p384_p8 = pneg %p383_p7 }
  0xa3   : > { %p389_p12 = pnand %p388_p11, %p384_p8 }
  0xa5   : > { %392 = shalt.err (!%p389_p12)
}
  0xa6   : > { %326 = dma.vmem_to_hbm [thread:$0]  (%p489_p5), %s232_s17, 128, %s229_s24, %s218_s26  }
  0xa7 PF: > { %p332_p13 = scmp.ge.s32.totalorder %s427_s15, 2  ;;  %s243_s8 = sand.u32 1, %s415_s12  }
  0xa8   : > { %s244_s9 = scalar_lea.sflag [#allocation3], %s243_s8 }
  0xa9   : > { %p329_p0 = pnand %p332_p13, %p493_p6 }
  0xab   : > { %p330_p1 = pneg %p329_p0 }
  0xad   : > { %410 = dma.done.wait (%p330_p1), %s244_s9, 128  }
  0xae   : > { %412 = vsyncadd (%p330_p1), %s244_s9, 4294967168  ;;  %p13_p2 = scmp.ge.s32.totalorder %s476_s18, 4   ;;  %s550_s12 = smov %s419_s13 }
  0xaf   : > { %s551_s13 = smov %s423_s14  ;;  %s552_s14 = smov %s487_s21 }
  0xb0   : > { %s553_s15 = smov %s476_s18  ;;  %15 = sbr.rel (!%p13_p2) target bundleno = 3 (0x3), region = 73 }
  0xb5   :  { %249 = vsyncpa [#allocation3], 1 }
  0xb6   :  { %251 = vsyncpa [#allocation3 + $0x1], 1 }

</bundles_post_ra>
